<compile_context>
chip_gen: v7x
topology: tpu7x:2x2x1
jax: 0.10.0
libtpu: 0.0.40
codegen_flags: <defaults>
</compile_context>

<pallas_src>
import functools

import jax
import jax.numpy as jnp
import numpy as np
from jax.experimental import pallas as pl
from jax.experimental.pallas import tpu as pltpu


def _sumsq3(a):
    """(Pb, M, N) -> (Pb, 1, 1) sum of squares, staying 2D+ the whole way."""
    s = jnp.sum(a * a, axis=2, keepdims=True)          # (Pb, M, 1)  lane reduce
    return jnp.sum(s, axis=1, keepdims=True)           # (Pb, 1, 1)  sublane reduce


def _pearlmutter_euclidean_kernel(x_ref, t_ref, wg_ref, bg_ref, out_ref, *,
                                  inv_n, scale):
    # Each grid step handles a block of P_BLK independent problem instances.
    x = x_ref[...]                                      # (Pb, B, D)  candidate
    t = t_ref[...]                                      # (Pb, B, C)  labels
    wg = wg_ref[...]                                    # (Pb, 2, D, C)
    bg = bg_ref[...]                                    # (Pb, 2, 1, C)

    w = wg[:, 0]                                        # (Pb, D, C)  Linear W
    gw_data = wg[:, 1]                                  # (Pb, D, C)  gradient_data
    b = bg[:, 0]                                        # (Pb, 1, C)  Linear b
    gb_data = bg[:, 1]                                  # (Pb, 1, C)

    # ---- forward: y = x @ W + b ; MSELoss(reduction='mean') -----------------
    # f32 MXU path; the matmuls are tiny so bf16 would buy nothing here.
    y = jnp.einsum('pbd,pdc->pbc', x, w,
                   preferred_element_type=jnp.float32) + b            # (Pb,B,C)
    r = y - t
    task_loss = _sumsq3(r) * inv_n                                    # (Pb,1,1)

    # ---- analytic single-step gradient w.r.t. (W, b) ------------------------
    d_y = (2.0 * inv_n) * r                                           # dL/dy
    # dL/dW = x^T @ dL/dy : small in-kernel transpose (one vreg, XLU is idle),
    # then a canonical batched MXU matmul.
    xt = jnp.swapaxes(x, 1, 2)                                        # (Pb,D,B)
    g_w = jnp.einsum('pdb,pbc->pdc', xt, d_y,
                     preferred_element_type=jnp.float32)              # (Pb,D,C)
    g_b = jnp.sum(d_y, axis=1, keepdims=True)                         # (Pb,1,C)

    # ---- Euclidean gradient-matching objective ------------------------------
    #   objective = 0.5 * scale * sum_r ||g_rec - g_data||^2
    dw = g_w - gw_data
    db = g_b - gb_data
    objective = 0.5 * scale * (_sumsq3(dw) + _sumsq3(db))             # (Pb,1,1)

    # Single combined output block: lane 0 = objective, lane 1 = task_loss.
    out_ref[:, :, 0:1] = objective
    out_ref[:, :, 1:2] = task_loss


def pearlmutter_euclidean_forward(x, w, b, labels, gw_data, gb_data, *,
                                  scale=1.0, task_regularization=0.0,
                                  p_block=None):
    """Batched forward over a leading problem axis P.

    Shapes: x (P,B,D), w (P,D,C), b (P,1,C), labels (P,B,C),
            gw_data (P,D,C), gb_data (P,1,C).
    Returns (objective (P,), task_loss (P,)), mirroring
    PearlmutterEuclidean.forward's (objective_value, task_loss) per instance.
    Note: task_regularization only affects candidate.grad in the PyTorch
    module, so it does not alter the returned objective (kept for API parity).
    """
    del task_regularization  # no effect on the returned values (matches PyTorch)
    P, B, D = x.shape
    C = w.shape[-1]

    # Pack parameters with their gradient_data counterparts -> 4 input streams
    # per grid step instead of 7 tiny ones.
    wg = jnp.stack([w, gw_data], axis=1)                  # (P, 2, D, C)
    bg = jnp.stack([b, gb_data], axis=1)                  # (P, 2, 1, C)

    # Block the problem axis.  Keep >= 2 grid steps when possible so v7x's two
    # TensorCores both get work; cap the block so VMEM stays tiny.
    if p_block is None:
        p_block = max(1, min(16, -(-P // 2)))
    p_block = min(p_block, P)
    n_blocks = -(-P // p_block)
    p_pad = n_blocks * p_block
    if p_pad != P:
        def pad0(a):
            return jnp.pad(a, [(0, p_pad - P)] + [(0, 0)] * (a.ndim - 1))
        x, labels, wg, bg = pad0(x), pad0(labels), pad0(wg), pad0(bg)

    kernel = functools.partial(_pearlmutter_euclidean_kernel,
                               inv_n=1.0 / float(B * C), scale=float(scale))

    def vspec(block_shape):
        nd = len(block_shape)
        return pl.BlockSpec(block_shape,
                            lambda p, _nd=nd: (p,) + (0,) * (_nd - 1))

    flops = p_pad * (2 * B * D * C + 2 * D * B * C + 10 * B * C + 6 * D * C)
    bytes_accessed = 4 * (x.size + labels.size + wg.size + bg.size + p_pad * 2)

    out = pl.pallas_call(
        kernel,
        grid=(n_blocks,),
        out_shape=jax.ShapeDtypeStruct((p_pad, 1, 2), jnp.float32),
        in_specs=[vspec((p_block, B, D)),        # x
                  vspec((p_block, B, C)),        # labels
                  vspec((p_block, 2, D, C)),     # [W ; gW_data]
                  vspec((p_block, 2, 1, C))],    # [b ; gb_data]
        out_specs=vspec((p_block, 1, 2)),
        compiler_params=pltpu.CompilerParams(
            # independent problem blocks -> shard across TensorCores on v7x
            dimension_semantics=("parallel",)),
        cost_estimate=pl.CostEstimate(flops=flops, transcendentals=0,
                                      bytes_accessed=bytes_accessed),
    )(x, labels, wg, bg)

    objective = out[:P, 0, 0]
    task_loss = out[:P, 0, 1]
    return objective, task_loss


def _reference(x, w, b, t, gw_data, gb_data, scale=1.0):
    """Pure-JAX f32 reference for one problem instance."""
    B, C = t.shape
    y = x @ w + b
    r = y - t
    task_loss = jnp.mean(r * r)
    d_y = 2.0 * r / (B * C)
    g_w = x.T @ d_y
    g_b = jnp.sum(d_y, axis=0, keepdims=True)
    obj = 0.5 * scale * (jnp.sum((g_w - gw_data) ** 2)
                         + jnp.sum((g_b - gb_data) ** 2))
    return obj, task_loss


if __name__ == "__main__":
    key = jax.random.PRNGKey(0)
    kx, kw, kb, kt, kgw, kgb = jax.random.split(key, 6)
    # P independent problem instances; C chosen lane-dense (multiple of 128).
    P, B, D, C = 8, 8, 32, 128

    x = jax.random.normal(kx, (P, B, D), jnp.float32)                 # candidates
    w = 0.1 * jax.random.normal(kw, (P, D, C), jnp.float32)           # Linear W
    b = 0.1 * jax.random.normal(kb, (P, 1, C), jnp.float32)           # Linear b
    labels = jax.random.normal(kt, (P, B, C), jnp.float32)            # MSE targets
    gw_data = 0.01 * jax.random.normal(kgw, (P, D, C), jnp.float32)   # gradient_data
    gb_data = 0.01 * jax.random.normal(kgb, (P, 1, C), jnp.float32)

    objective, task_loss = pearlmutter_euclidean_forward(
        x, w, b, labels, gw_data, gb_data)
    jax.block_until_ready((objective, task_loss))

    ref_obj, ref_loss = jax.vmap(_reference)(x, w, b, labels, gw_data, gb_data)
    assert np.allclose(np.asarray(objective), np.asarray(ref_obj),
                       rtol=5e-3, atol=1e-4), (objective, ref_obj)
    assert np.allclose(np.asarray(task_loss), np.asarray(ref_loss),
                       rtol=5e-3, atol=1e-4), (task_loss, ref_loss)
    print("KERNEL_OK")
</pallas_src>

<mosaic_0001>
module attributes {stable_mosaic.version = 11 : i64} {
  func.func @_pearlmutter_euclidean_kernel(%arg0: i32, %arg1: memref<4x8x32xf32, #tpu.memory_space<vmem>>, %arg2: memref<4x8x128xf32, #tpu.memory_space<vmem>>, %arg3: memref<4x2x32x128xf32, #tpu.memory_space<vmem>>, %arg4: memref<4x2x1x128xf32, #tpu.memory_space<vmem>>, %arg5: memref<4x1x2xf32, #tpu.memory_space<vmem>>) attributes {dimension_semantics = [#tpu.dimension_semantics<parallel>], iteration_bounds = array<i64: 2>, scalar_prefetch = 0 : i64, scratch_operands = 0 : i64, tpu.core_type = #tpu.core_type<tc>, window_params = [{transform_indices = @transform_0, window_bounds = array<i64: 4, 8, 32>}, {transform_indices = @transform_1, window_bounds = array<i64: 4, 8, 128>}, {transform_indices = @transform_2, window_bounds = array<i64: 4, 2, 32, 128>}, {transform_indices = @transform_3, window_bounds = array<i64: 4, 2, 1, 128>}, {transform_indices = @transform_4, window_bounds = array<i64: 4, 1, 2>}]} {
    %c0 = arith.constant 0 : index
    %c0_0 = arith.constant 0 : index
    %c0_1 = arith.constant 0 : index
    %0 = vector.load %arg1[%c0, %c0_0, %c0_1] : memref<4x8x32xf32, #tpu.memory_space<vmem>>, vector<4x8x32xf32>
    %c0_2 = arith.constant 0 : index
    %c0_3 = arith.constant 0 : index
    %c0_4 = arith.constant 0 : index
    %1 = vector.load %arg2[%c0_2, %c0_3, %c0_4] : memref<4x8x128xf32, #tpu.memory_space<vmem>>, vector<4x8x128xf32>
    %c0_5 = arith.constant 0 : index
    %c0_6 = arith.constant 0 : index
    %c0_7 = arith.constant 0 : index
    %c0_8 = arith.constant 0 : index
    %2 = vector.load %arg3[%c0_5, %c0_6, %c0_7, %c0_8] : memref<4x2x32x128xf32, #tpu.memory_space<vmem>>, vector<4x2x32x128xf32>
    %c0_9 = arith.constant 0 : index
    %c0_10 = arith.constant 0 : index
    %c0_11 = arith.constant 0 : index
    %c0_12 = arith.constant 0 : index
    %3 = vector.load %arg4[%c0_9, %c0_10, %c0_11, %c0_12] : memref<4x2x1x128xf32, #tpu.memory_space<vmem>>, vector<4x2x1x128xf32>
    %4 = vector.extract_strided_slice %2 {offsets = [0, 0, 0, 0], sizes = [4, 1, 32, 128], strides = [1, 1, 1, 1]} : vector<4x2x32x128xf32> to vector<4x1x32x128xf32>
    %5 = vector.shape_cast %4 : vector<4x1x32x128xf32> to vector<4x32x128xf32>
    %6 = vector.extract_strided_slice %2 {offsets = [0, 1, 0, 0], sizes = [4, 1, 32, 128], strides = [1, 1, 1, 1]} : vector<4x2x32x128xf32> to vector<4x1x32x128xf32>
    %7 = vector.shape_cast %6 : vector<4x1x32x128xf32> to vector<4x32x128xf32>
    %8 = vector.extract_strided_slice %3 {offsets = [0, 0, 0, 0], sizes = [4, 1, 1, 128], strides = [1, 1, 1, 1]} : vector<4x2x1x128xf32> to vector<4x1x1x128xf32>
    %9 = vector.shape_cast %8 : vector<4x1x1x128xf32> to vector<4x1x128xf32>
    %10 = vector.extract_strided_slice %3 {offsets = [0, 1, 0, 0], sizes = [4, 1, 1, 128], strides = [1, 1, 1, 1]} : vector<4x2x1x128xf32> to vector<4x1x1x128xf32>
    %11 = vector.shape_cast %10 : vector<4x1x1x128xf32> to vector<4x1x128xf32>
    "tpu.trace_start"() <{level = 10 : i32, message = "pbd,pdc->pbc"}> : () -> ()
    %cst = arith.constant dense<0.000000e+00> : vector<4x8x128xf32>
    %12 = tpu.matmul %0, %5, %cst {dimension_numbers = #tpu.dot_dimension_numbers<[2], [1], [1], [2], [0, 0, 0, 1, 1, 2], [0], [0]>} : vector<4x8x32xf32>, vector<4x32x128xf32>, vector<4x8x128xf32> -> vector<4x8x128xf32>
    "tpu.trace_stop"() : () -> ()
    %13 = vector.broadcast %9 : vector<4x1x128xf32> to vector<4x8x128xf32>
    %14 = arith.addf %12, %13 : vector<4x8x128xf32>
    %15 = arith.subf %14, %1 : vector<4x8x128xf32>
    %16 = arith.mulf %15, %15 : vector<4x8x128xf32>
    %cst_13 = arith.constant dense<0.000000e+00> : vector<4x8xf32>
    %17 = vector.multi_reduction <add>, %16, %cst_13 [2] : vector<4x8x128xf32> to vector<4x8xf32>
    %18 = vector.shape_cast %17 : vector<4x8xf32> to vector<4x8x1xf32>
    %cst_14 = arith.constant dense<0.000000e+00> : vector<4x1xf32>
    %19 = vector.multi_reduction <add>, %18, %cst_14 [1] : vector<4x8x1xf32> to vector<4x1xf32>
    %20 = vector.shape_cast %19 : vector<4x1xf32> to vector<4x1x1xf32>
    %cst_15 = arith.constant 9.765625E-4 : f32
    %21 = vector.broadcast %cst_15 : f32 to vector<4x1x1xf32>
    %22 = arith.mulf %20, %21 : vector<4x1x1xf32>
    %cst_16 = arith.constant 0.001953125 : f32
    %23 = vector.broadcast %cst_16 : f32 to vector<4x8x128xf32>
    %24 = arith.mulf %23, %15 : vector<4x8x128xf32>
    %25 = tpu.transpose %0, [0, 2, 1] : vector<4x8x32xf32> -> vector<4x32x8xf32>
    "tpu.trace_start"() <{level = 10 : i32, message = "pdb,pbc->pdc"}> : () -> ()
    %cst_17 = arith.constant dense<0.000000e+00> : vector<4x32x128xf32>
    %26 = tpu.matmul %25, %24, %cst_17 {dimension_numbers = #tpu.dot_dimension_numbers<[2], [1], [1], [2], [0, 0, 0, 1, 1, 2], [0], [0]>} : vector<4x32x8xf32>, vector<4x8x128xf32>, vector<4x32x128xf32> -> vector<4x32x128xf32>
    "tpu.trace_stop"() : () -> ()
    %cst_18 = arith.constant dense<0.000000e+00> : vector<4x128xf32>
    %27 = vector.multi_reduction <add>, %24, %cst_18 [1] : vector<4x8x128xf32> to vector<4x128xf32>
    %28 = vector.shape_cast %27 : vector<4x128xf32> to vector<4x1x128xf32>
    %29 = arith.subf %26, %7 : vector<4x32x128xf32>
    %30 = arith.subf %28, %11 : vector<4x1x128xf32>
    %31 = arith.mulf %29, %29 : vector<4x32x128xf32>
    %cst_19 = arith.constant dense<0.000000e+00> : vector<4x32xf32>
    %32 = vector.multi_reduction <add>, %31, %cst_19 [2] : vector<4x32x128xf32> to vector<4x32xf32>
    %33 = vector.shape_cast %32 : vector<4x32xf32> to vector<4x32x1xf32>
    %cst_20 = arith.constant dense<0.000000e+00> : vector<4x1xf32>
    %34 = vector.multi_reduction <add>, %33, %cst_20 [1] : vector<4x32x1xf32> to vector<4x1xf32>
    %35 = vector.shape_cast %34 : vector<4x1xf32> to vector<4x1x1xf32>
    %36 = arith.mulf %30, %30 : vector<4x1x128xf32>
    %cst_21 = arith.constant dense<0.000000e+00> : vector<4x1xf32>
    %37 = vector.multi_reduction <add>, %36, %cst_21 [2] : vector<4x1x128xf32> to vector<4x1xf32>
    %38 = vector.shape_cast %37 : vector<4x1xf32> to vector<4x1x1xf32>
    %cst_22 = arith.constant dense<0.000000e+00> : vector<4x1xf32>
    %39 = vector.multi_reduction <add>, %38, %cst_22 [1] : vector<4x1x1xf32> to vector<4x1xf32>
    %40 = vector.shape_cast %39 : vector<4x1xf32> to vector<4x1x1xf32>
    %41 = arith.addf %35, %40 : vector<4x1x1xf32>
    %cst_23 = arith.constant 5.000000e-01 : f32
    %42 = vector.broadcast %cst_23 : f32 to vector<4x1x1xf32>
    %43 = arith.mulf %42, %41 : vector<4x1x1xf32>
    %c0_24 = arith.constant 0 : index
    %c0_25 = arith.constant 0 : index
    %c0_26 = arith.constant 0 : index
    %44 = vector.load %arg5[%c0_24, %c0_25, %c0_26] : memref<4x1x2xf32, #tpu.memory_space<vmem>>, vector<4x1x1xf32>
    tpu.vector_store %arg5[%c0_24, %c0_25, %c0_26], %43 {strides = array<i32>} : memref<4x1x2xf32, #tpu.memory_space<vmem>>, vector<4x1x1xf32>,
    %c0_27 = arith.constant 0 : index
    %c0_28 = arith.constant 0 : index
    %c1 = arith.constant 1 : index
    %45 = vector.load %arg5[%c0_27, %c0_28, %c1] : memref<4x1x2xf32, #tpu.memory_space<vmem>>, vector<4x1x1xf32>
    tpu.vector_store %arg5[%c0_27, %c0_28, %c1], %22 {strides = array<i32>} : memref<4x1x2xf32, #tpu.memory_space<vmem>>, vector<4x1x1xf32>,
    return
  }
  func.func @transform_0(%arg0: i32) -> (i32, i32, i32) {
    %c0_i32 = arith.constant 0 : i32
    %c0_i32_0 = arith.constant 0 : i32
    %c0_i32_1 = arith.constant 0 : i32
    return %arg0, %c0_i32, %c0_i32_0 : i32, i32, i32
  }
  func.func @transform_1(%arg0: i32) -> (i32, i32, i32) {
    %c0_i32 = arith.constant 0 : i32
    %c0_i32_0 = arith.constant 0 : i32
    %c0_i32_1 = arith.constant 0 : i32
    return %arg0, %c0_i32, %c0_i32_0 : i32, i32, i32
  }
  func.func @transform_2(%arg0: i32) -> (i32, i32, i32, i32) {
    %c0_i32 = arith.constant 0 : i32
    %c0_i32_0 = arith.constant 0 : i32
    %c0_i32_1 = arith.constant 0 : i32
    %c0_i32_2 = arith.constant 0 : i32
    return %arg0, %c0_i32, %c0_i32_0, %c0_i32_1 : i32, i32, i32, i32
  }
  func.func @transform_3(%arg0: i32) -> (i32, i32, i32, i32) {
    %c0_i32 = arith.constant 0 : i32
    %c0_i32_0 = arith.constant 0 : i32
    %c0_i32_1 = arith.constant 0 : i32
    %c0_i32_2 = arith.constant 0 : i32
    return %arg0, %c0_i32, %c0_i32_0, %c0_i32_1 : i32, i32, i32, i32
  }
  func.func @transform_4(%arg0: i32) -> (i32, i32, i32) {
    %c0_i32 = arith.constant 0 : i32
    %c0_i32_0 = arith.constant 0 : i32
    %c0_i32_1 = arith.constant 0 : i32
    return %arg0, %c0_i32, %c0_i32_0 : i32, i32, i32
  }
}

</mosaic_0001>

<bundles_post_ra>
// kernel: tpu_custom_call.1
= control target key start
LH: loop header
LB: loop body
LE: loop exit
PB: predicated region body
PF: predicated region fallthrough
CT: control target
= control target key end

     0   :  { %9 = vsyncpa [#allocation3], 0  ;;  %s2407_s0 = inlined_call_operand.hbm [shape: f32[8,8,32], index: 0, kind: input, shape index: {}]   ;;  %s2408_s1 = inlined_call_operand.hbm [shape: f32[8,8,128], index: 1, kind: input, shape index: {}]   ;;  %s2409_s2 = inlined_call_operand.hbm [shape: f32[8,2,32,128], index: 2, kind: input, shape index: {}]   ;;  %s2410_s3 = inlined_call_operand.hbm [shape: f32[8,2,1,128], index: 3, kind: input, shape index: {}]   ;;  %s2411_s4 = inlined_call_operand.vmem [shape: f32[8,1,2], index: 4, kind: output, shape index: {}]  }
   0x1   :  { %11 = vsyncpa [#allocation3 + $0x1], 0 }
   0x2   :  { %12 = vsyncpa [#allocation5], 0 }
   0x3   :  { %14 = vsyncpa [#allocation5 + $0x1], 0 }
   0x4   :  { %15 = vsyncpa [#allocation8], 0 }
   0x5   :  { %17 = vsyncpa [#allocation8 + $0x1], 0  ;;  %s2021_s15 = smov 0   ;;  %s2023_s16 = smov 0  }
   0x6   :  { %s2025_s17 = smov 0   ;;  %s2027_s18 = smov 0  }
   0x7 LB: > { %s2040_s19 = sadd.s32 4294967295, %s1983_s18   ;;  %s2043_s20 = sadd.s32 1, %s1983_s18   ;;  %s1983_s18 = sphi %s2027_s18, %s2424_s18   ;;  %s1979_s17 = sphi %s2025_s17, %s2423_s17   ;;  %s1975_s16 = sphi %s2023_s16, %s2422_s16   ;;  %s1971_s15 = sphi %s2021_s15, %s2421_s15  }
   0x8   : > { %s27_s21 = ssub.s32 %s1983_s18, %s2043_s20  ;;  %s30_s22 = sadd.s32 1, %s1979_s17 }
   0x9   : > { %p28_p0 = scmp.eq.s32.totalorder %s27_s21, 0  ;;  %p37_p1 = scmp.ne.s32.totalorder %s1979_s17, %s1975_s16 }
   0xa   : > { %p38_p2 = scmp.eq.s32.totalorder %s1983_s18, 0  ;;  %p43_p3 = scmp.ne.s32.totalorder %s1975_s16, %s1971_s15 }
   0xb   : > { %s2053_s23 = scalar_select %p28_p0, %s1979_s17, %s30_s22  }
   0xc   : > { %p39_p4 = por %p38_p2, %p37_p1  ;;  %p44_p5 = scmp.eq.s32.totalorder %s2040_s19, 0 }
   0xd   : > { %p1781_p6 = scmp.lt.s32.totalorder %s1983_s18, 2  ;;  %s2062_s25 = sand.u32 1, %s1979_s17  }
   0xe   : > { %p2057_p7 = por %p44_p5, %p43_p3  ;;  %s1568_s26 = sshll.u32 %s2062_s25, 5 }
   0xf   : > { %s1614_s27 = sshll.u32 %s1983_s18, 9  ;;  %p2066_p8 = pnand %p1781_p6, %p39_p4 }
  0x10   : > { %s2413_s24 = scalar_select %p2057_p7, 1, 0 }
  0x11   : > { %s192_s29 = sand.u32 1, %s1983_s18   ;;  %s2076_s6 = scalar_lea.hbm %s2408_s1, %s1614_s27 }
  0x12   : > { %s196_s7 = scalar_lea.vmem [#allocation4], %s1568_s26  ;;  %s2084_s9 = scalar_lea.sflag [#allocation5], %s192_s29 }
  0x13   : > { %s203_s8 = sshll.u32 %s196_s7, 4  ;;  %s1821_s10 = scalar_lea.hbm %s2076_s6, 512  ;;  %s2081_s8 = int_to_ptr.vmem [resolvable:$true] %s203_s8 }
  0x14   : > { %p1822_p11 = scmp.ne.s32.totalorder %s2076_s6, %s1821_s10  ;;  %p2090_p12 = pneg %p2066_p8 }
  0x15   : > { %s1826_s14 = scalar_lea.hbm %s2408_s1, 1024  ;;  %p1827_p1 = scmp.lt.u32.totalorder %s2076_s6, %s2408_s1 }
  0x16   : > { %p1824_p13 = pnand %p2090_p12, %p1822_p11  ;;  %p1828_p2 = scmp.lt.u32.totalorder %s1826_s14, %s1821_s10 }
  0x17   : > { %p1830_p4 = scmp.lt.u32.totalorder %s1821_s10, %s2076_s6 }
  0x18   : > { %p1825_p0 = pneg %p1824_p13  ;;  %p1829_p3 = por %p1828_p2, %p1827_p1 }
  0x1a   : > { %p1831_p5 = por %p1830_p4, %p1829_p3 }
  0x1c   : > { %p1832_p6 = pnand %p1831_p5, %p1825_p0 }
  0x1e   : > { %1835 = shalt.err (!%p1832_p6)
}
  0x1f   : > { %s1836_s22 = scalar_lea.vmem %s2081_s8, 512  ;;  %s1985_s29 = smov [#allocation4]  }
  0x20   : > { %p1837_p11 = scmp.ne.s32.totalorder %s2081_s8, %s1836_s22  ;;  %s1841_s30 = sshll.u32 %s1985_s29, 4  ;;  %s1842_s30 = int_to_ptr.vmem [resolvable:$false] %s1841_s30 }
  0x21   : > { %s1843_s5 = scalar_lea.vmem %s1842_s30, 1024  ;;  %p1844_p10 = scmp.lt.s32.totalorder %s2081_s8, %s1842_s30 }
  0x22   : > { %p1839_p13 = pnand %p1837_p11, %p2090_p12  ;;  %p1845_p7 = scmp.lt.s32.totalorder %s1843_s5, %s1836_s22 }
  0x24   : > { %p1840_p9 = pneg %p1839_p13  ;;  %p1846_p1 = por %p1845_p7, %p1844_p10 }
  0x26   : > { %p1847_p2 = pnand %p1846_p1, %p1840_p9 }
  0x28   : > { %1850 = shalt.err (!%p1847_p2)
}
  0x29   : > { %s1986_s7 = smov 128   ;;  %s1987_s10 = smov 8  }
  0x2a   : > { %1774 = dma.hbm_to_vmem [thread:$0]  (!%p2066_p8), %s2076_s6, 512, %s2081_s8, %s2084_s9, %s1986_s7, %s1986_s7, %s1987_s10  }
  0x2b   : > { %p2416_p7 = scmp.lt.s32.totalorder %s1983_s18, 3  ;;  %p2417_p9 = scmp.ge.s32.totalorder %s1983_s18, 1 }
  0x2c   : > { %s2130_s15 = scalar_lea.hbm %s2407_s0, %s1614_s27  ;;  %s175_s21 = scalar_lea.vmem [#allocation2], %s1568_s26 }
  0x2d   : > { %p2121_p10 = pnand %p2417_p9, %p2416_p7  ;;  %s182_s22 = sshll.u32 %s175_s21, 4  ;;  %s2135_s22 = int_to_ptr.vmem [resolvable:$true] %s182_s22 }
  0x2e   : > { %s1574_s6 = sshll.u32 %s2062_s25, 8  ;;  %s172_s8 = scalar_lea.sflag [#allocation3], %s2062_s25 }
  0x2f   : > { %s2418_s12 = scalar_select %p2121_p10, 1, 0 }
  0x30   : > { %s1851_s29 = scalar_lea.hbm %s2130_s15, 512  ;;  %s1856_s27 = scalar_lea.hbm %s2407_s0, 1024 }
  0x31   : > { %p1852_p0 = scmp.ne.s32.totalorder %s2130_s15, %s1851_s29  ;;  %p1857_p5 = scmp.lt.u32.totalorder %s2130_s15, %s2407_s0 }
  0x32   : > { %p1858_p6 = scmp.lt.u32.totalorder %s1856_s27, %s1851_s29  ;;  %p1860_p13 = scmp.lt.u32.totalorder %s1851_s29, %s2130_s15 }
  0x33   : > { %p1854_p3 = pnand %p1852_p0, %p2090_p12 }
  0x34   : > { %p1859_p11 = por %p1858_p6, %p1857_p5 }
  0x35   : > { %p1855_p4 = pneg %p1854_p3 }
  0x36   : > { %p1861_p1 = por %p1860_p13, %p1859_p11 }
  0x38   : > { %p1862_p2 = pnand %p1861_p1, %p1855_p4 }
  0x3a   : > { %1865 = shalt.err (!%p1862_p2)
}
  0x3b   : > { %s1866_s26 = scalar_lea.vmem %s2135_s22, 512  ;;  %s1988_s21 = smov [#allocation2]  }
  0x3c   : > { %p1867_p7 = scmp.ne.s32.totalorder %s2135_s22, %s1866_s26  ;;  %s1871_s30 = sshll.u32 %s1988_s21, 4  ;;  %s1872_s30 = int_to_ptr.vmem [resolvable:$false] %s1871_s30 }
  0x3d   : > { %s1873_s5 = scalar_lea.vmem %s1872_s30, 1024  ;;  %p1874_p3 = scmp.lt.s32.totalorder %s2135_s22, %s1872_s30 }
  0x3e   : > { %p1869_p9 = pnand %p1867_p7, %p2090_p12  ;;  %p1875_p10 = scmp.lt.s32.totalorder %s1873_s5, %s1866_s26 }
  0x40   : > { %p1870_p0 = pneg %p1869_p9  ;;  %p1876_p5 = por %p1875_p10, %p1874_p3 }
  0x42   : > { %p1877_p6 = pnand %p1876_p5, %p1870_p0 }
  0x44   : > { %1880 = shalt.err (!%p1877_p6)
}
  0x45   : > { %1771 = dma.hbm_to_vmem [thread:$0]  (!%p2066_p8), %s2130_s15, 512, %s2135_s22, %s172_s8, %s1986_s7, %s1986_s7, %s1987_s10  }
  0x46   : > { %s1617_s29 = sshll.u32 %s1983_s18, 12  ;;  %s217_s27 = scalar_lea.vmem [#allocation6], %s1574_s6 }
  0x47   : > { %s225_s13 = sshll.u32 %s217_s27, 4  ;;  %s2170_s21 = scalar_lea.hbm %s2409_s2, %s1617_s29  ;;  %s2172_s13 = int_to_ptr.vmem [resolvable:$true] %s225_s13 }
  0x48   : > { %s1881_s30 = scalar_lea.hbm %s2170_s21, 4096  ;;  %s1886_s6 = scalar_lea.hbm %s2409_s2, 8192 }
  0x49   : > { %p1882_p10 = scmp.ne.s32.totalorder %s2170_s21, %s1881_s30  ;;  %p1887_p13 = scmp.lt.u32.totalorder %s2170_s21, %s2409_s2 }
  0x4a   : > { %p1888_p1 = scmp.lt.u32.totalorder %s1886_s6, %s1881_s30  ;;  %p1890_p7 = scmp.lt.u32.totalorder %s1881_s30, %s2170_s21 }
  0x4b   : > { %p1884_p4 = pnand %p1882_p10, %p2090_p12 }
  0x4c   : > { %p1889_p2 = por %p1888_p1, %p1887_p13 }
  0x4d   : > { %p1885_p11 = pneg %p1884_p4 }
  0x4e   : > { %p1891_p9 = por %p1890_p7, %p1889_p2 }
  0x50   : > { %p1892_p0 = pnand %p1891_p9, %p1885_p11 }
  0x52   : > { %1895 = shalt.err (!%p1892_p0)
}
  0x53   : > { %s1896_s29 = scalar_lea.vmem %s2172_s13, 4096  ;;  %s1989_s27 = smov [#allocation6]  }
  0x54   : > { %p1897_p3 = scmp.ne.s32.totalorder %s2172_s13, %s1896_s29  ;;  %s1901_s14 = sshll.u32 %s1989_s27, 4  ;;  %s1902_s14 = int_to_ptr.vmem [resolvable:$false] %s1901_s14 }
  0x55   : > { %s1903_s26 = scalar_lea.vmem %s1902_s14, 8192  ;;  %p1904_p10 = scmp.lt.s32.totalorder %s2172_s13, %s1902_s14 }
  0x56   : > { %p1899_p5 = pnand %p1897_p3, %p2090_p12  ;;  %p1905_p4 = scmp.lt.s32.totalorder %s1903_s26, %s1896_s29 }
  0x58   : > { %p1900_p6 = pneg %p1899_p5  ;;  %p1906_p13 = por %p1905_p4, %p1904_p10 }
  0x5a   : > { %p1907_p1 = pnand %p1906_p13, %p1900_p6 }
  0x5c   : > { %1910 = shalt.err (!%p1907_p1)
}
  0x5d   : > { %1777 = dma.hbm_to_vmem [thread:$0]  (!%p2066_p8), %s2170_s21, 4096, %s2172_s13, %s2084_s9, %s1986_s7, %s1986_s7, %s1987_s10  }
  0x5e   : > { %s1578_s30 = sshll.u32 %s2062_s25, 3  ;;  %s1619_s15 = sshll.u32 %s1983_s18, 7 }
  0x5f   : > { %s2204_s8 = scalar_lea.hbm %s2410_s3, %s1619_s15  ;;  %s239_s5 = scalar_lea.vmem [#allocation7], %s1578_s30 }
  0x60   : > { %s247_s29 = sshll.u32 %s239_s5, 4  ;;  %s236_s27 = scalar_lea.sflag [#allocation8], %s2062_s25  ;;  %s2206_s29 = int_to_ptr.vmem [resolvable:$true] %s247_s29 }
  0x61   : > { %s1911_s14 = scalar_lea.hbm %s2204_s8, 128  ;;  %s1916_s7 = scalar_lea.hbm %s2410_s3, 256 }
  0x62   : > { %p1912_p11 = scmp.ne.s32.totalorder %s2204_s8, %s1911_s14  ;;  %p1917_p9 = scmp.lt.u32.totalorder %s2204_s8, %s2410_s3 }
  0x63   : > { %p1918_p0 = scmp.lt.u32.totalorder %s1916_s7, %s1911_s14  ;;  %p1920_p5 = scmp.lt.u32.totalorder %s1911_s14, %s2204_s8 }
  0x64   : > { %p1914_p2 = pnand %p1912_p11, %p2090_p12 }
  0x65   : > { %p1919_p3 = por %p1918_p0, %p1917_p9 }
  0x66   : > { %p1915_p7 = pneg %p1914_p2 }
  0x67   : > { %p1921_p6 = por %p1920_p5, %p1919_p3 }
  0x69   : > { %p1922_p10 = pnand %p1921_p6, %p1915_p7 }
  0x6b   : > { %1925 = shalt.err (!%p1922_p10)
}
  0x6c   : > { %s1926_s21 = scalar_lea.vmem %s2206_s29, 128  ;;  %s1990_s26 = smov [#allocation7]  }
  0x6d   : > { %p1927_p4 = scmp.ne.s32.totalorder %s2206_s29, %s1926_s21  ;;  %s1931_s30 = sshll.u32 %s1990_s26, 4  ;;  %s1932_s30 = int_to_ptr.vmem [resolvable:$false] %s1931_s30 }
  0x6e   : > { %s1933_s15 = scalar_lea.vmem %s1932_s30, 256  ;;  %p1934_p11 = scmp.lt.s32.totalorder %s2206_s29, %s1932_s30 }
  0x6f   : > { %p1929_p13 = pnand %p1927_p4, %p2090_p12  ;;  %p1935_p2 = scmp.lt.s32.totalorder %s1933_s15, %s1926_s21 }
  0x71   : > { %p1930_p1 = pneg %p1929_p13  ;;  %p1936_p9 = por %p1935_p2, %p1934_p11 }
  0x73   : > { %p1937_p0 = pnand %p1936_p9, %p1930_p1 }
  0x75   : > { %1940 = shalt.err (!%p1937_p0)
}
  0x76   : > { %s1991_s22 = smov 16   ;;  %s1992_s6 = smov 1  }
  0x77   : > { %1780 = dma.hbm_to_vmem [thread:$0]  (!%p2066_p8), %s2204_s8, 128, %s2206_s29, %s236_s27, %s1991_s22, %s1991_s22, %s1992_s6  }
  0x78   : > { %p2419_p12 = scmp.ne.s32.totalorder %s2418_s12, 0 }
  0x79   : > { %s261_s11 = sand.u32 (!%p2419_p12), 1, %s1975_s16   ;;  %p2420_p7 = scmp.ne.s32.totalorder (!%p2419_p12), %s2413_s24, 0 }
  0x7a   : > { %259 = sbr.rel (%p2419_p12) target bundleno = 780 (0x30c), region = 36  ;;  %s1583_s5 = sshll.u32 (!%p2419_p12), %s261_s11, 5 }
  0x7b   : > { %s262_s14 = scalar_lea.sflag (!%p2419_p12), [#allocation3], %s261_s11  ;;  %s2235_s18 = scalar_lea.vmem (!%p2419_p12), [#allocation2], %s1583_s5 }
  0x81   : > { %1958 = dma.done.wait (%p2420_p7), %s262_s14, 512  }
  0x82   : > { %1960 = vsyncadd (%p2420_p7), %s262_s14, 4294966784  ;;  %s270_s28 = sand.u32 1, %s2040_s19   ;;  %s2242_s8 = scalar_lea.vmem [#allocation4], %s1583_s5 }
  0x83   : > { %s271_s25 = scalar_lea.sflag [#allocation5], %s270_s28 }
  0x84   : > { %1962 = dma.done.wait (%p2420_p7), %s271_s25, 4608  }
  0x85   : > { %1964 = vsyncadd (%p2420_p7), %s271_s25, 4294962688  ;;  %s1585_s12 = sshll.u32 %s261_s11, 8  ;;  %s1586_s29 = sshll.u32 %s261_s11, 3 }
  0x86   : > { %s2248_s27 = scalar_lea.vmem [#allocation6], %s1585_s12  ;;  %s289_s9 = scalar_lea.sflag [#allocation8], %s261_s11 }
  0x87   : > { %s2250_s7 = scalar_lea.vmem [#allocation7], %s1586_s29 }
  0x88   : > { %1966 = dma.done.wait (%p2420_p7), %s289_s9, 128  }
  0x89   : > { %1968 = vsyncadd (%p2420_p7), %s289_s9, 4294967168  ;;  %v1993_v0 = vmov 0.0|0.0   ;;  %vm1994_vm0 = vmmov 0   ;;  %v1995_v1 = vmov 0.0   ;;  %v348_v2 = vld [vmem:[%s2248_s27] sm:$0xff]  ;;  %v349_v3 = vld [vmem:[%s2248_s27 + $0x8] sm:$0xff] }
  0x8a   : > { %1736 = vmatprep.subr.bf16.mxu0 %v1993_v0  ;;  %1742 = vmatprep.subr.bf16.mxu1 %v1993_v0  ;;  %v356_v4 = vld [vmem:[%s2248_s27 + $0x40] sm:$0xff]  ;;  %v1737_v5 = vpack.c.bf16 %v349_v3, %v348_v2  ;;  %v357_v6 = vld [vmem:[%s2248_s27 + $0x48] sm:$0xff]  ;;  %v350_v7 = vld [vmem:[%s2248_s27 + $0x10] sm:$0xff]  ;;  %vm412_vm1 = vcmask 261120   ;;  %vm881_vm2 = vcmask 64512   ;;  %vm1402_vm3 = vcmask 1040384  }
  0x8b   : > { %1668 = vmatprep.mubr.msk.f32.mxu0 %vm1994_vm0, %v1995_v1  ;;  %1679 = vmatprep.mubr.msk.f32.mxu1 %vm1994_vm0, %v1995_v1  ;;  %v351_v8 = vld [vmem:[%s2248_s27 + $0x18] sm:$0xff]  ;;  %v1743_v9 = vpack.c.bf16 %v357_v6, %v356_v4  ;;  %v358_v10 = vld [vmem:[%s2248_s27 + $0x50] sm:$0xff]  ;;  %v340_v12 = vld [vmem:[%s2235_s18] sm:$0xff]  ;;  %s1587_s24 = sshll.u32 %s2040_s19, 2  ;;  %vm1427_vm4 = vcmask 0   ;;  %vm1432_vm5 = vcmask 8200  }
  0x8c   : > { %v359_v11 = vld [vmem:[%s2248_s27 + $0x58] sm:$0xff]  ;;  %1738 = vmatpush3.bf16.msra.mxu0 %v1737_v5  ;;  %v1740_v13 = vpack.c.bf16 %v351_v8, %v350_v7  ;;  %753 = vxpose.xlu0.b32.start.end [1/1] (short) (narrow) %v340_v12, 32  ;;  %v364_v15 = vld [vmem:[%s2248_s27 + $0x80] sm:$0xff]  ;;  %v365_v16 = vld [vmem:[%s2248_s27 + $0x88] sm:$0xff]  ;;  %p336_p8 = scmp.lt.s32.totalorder %s1587_s24, 7 }
  0x8d   : > { %1744 = vmatpush3.bf16.msra.mxu1 %v1743_v9  ;;  %1739 = vmatprep.subr.bf16.mxu0 %v1993_v0  ;;  %v1746_v14 = vpack.c.bf16 %v359_v11, %v358_v10  ;;  %v372_v17 = vld [vmem:[%s2248_s27 + $0xc0] sm:$0xff]  ;;  %v373_v18 = vld [vmem:[%s2248_s27 + $0xc8] sm:$0xff]  ;;  %v342_v19 = vld [vmem:[%s2235_s18 + $0x10] sm:$0xff]  ;;  %v1749_v20 = vpack.c.bf16 %v365_v16, %v364_v15 }
  0x8e   : > { %1745 = vmatprep.subr.bf16.mxu1 %v1993_v0  ;;  %817 = vxpose.xlu1.b32.start.end [1/1] (short) (narrow) %v342_v19, 32  ;;  %v341_v21 = vld [vmem:[%s2235_s18 + $0x8] sm:$0xff]  ;;  %v1755_v22 = vpack.c.bf16 %v373_v18, %v372_v17  ;;  %v366_v23 = vld [vmem:[%s2248_s27 + $0x90] sm:$0xff]  ;;  %v367_v24 = vld [vmem:[%s2248_s27 + $0x98] sm:$0xff]  ;;  %s2426_s24 = smov (!%p336_p8, %s1587_s24), 7 }
  0x8f   : > { %v374_v25 = vld [vmem:[%s2248_s27 + $0xd0] sm:$0xff]  ;;  %v375_v26 = vld [vmem:[%s2248_s27 + $0xd8] sm:$0xff]  ;;  %v1752_v27 = vpack.c.bf16 %v367_v24, %v366_v23  ;;  %v1588_v39 = vld [vmem:[%s2250_s7] ss:$0 sm:$0xff]  ;;  %s2380_s13 = scalar_lea.vmem %s2411_s4, %s2426_s24 }
  0x90   : > { %1741 = vmatpush3.bf16.msra.mxu0 %v1740_v13  ;;  %v1758_v28 = vpack.c.bf16 %v375_v26, %v374_v25  ;;  %v343_v29 = vld [vmem:[%s2235_s18 + $0x18] sm:$0xff]  ;;  %v1589_v40 = vld [vmem:[%s2250_s7 + $0x2] ss:$0 sm:$0xff]  ;;  %v1590_v56 = vld [vmem:[%s2250_s7 + $0x4] ss:$0 sm:$0xff] }
  0x91   : > { %1747 = vmatpush3.bf16.msra.mxu1 %v1746_v14  ;;  %1748 = vmatprep.subr.bf16.mxu0 %v1993_v0  ;;  %v344_v42 = vld [vmem:[%s2242_s8] sm:$0xff]  ;;  %v345_v46 = vld [vmem:[%s2242_s8 + $0x8] sm:$0xff]  ;;  %v346_v59 = vld [vmem:[%s2242_s8 + $0x10] sm:$0xff] }
  0x92   : > { %1754 = vmatprep.subr.bf16.mxu1 %v1993_v0  ;;  %v1591_v57 = vld [vmem:[%s2250_s7 + $0x6] ss:$0 sm:$0xff]  ;;  %v347_v62 = vld [vmem:[%s2242_s8 + $0x18] sm:$0xff] }
  0x93   : > { %1669 = vmatmul.mubr.msk.f32.vlgmr.msra.gmra.mrb[0].mxu0 %vm412_vm1, %v340_v12  ;;  %v353_v10 = vld [vmem:[%s2248_s27 + $0x28] sm:$0xff]  ;;  %v352_v11 = vld [vmem:[%s2248_s27 + $0x20] sm:$0xff]  ;;  %v355_v18 = vld [vmem:[%s2248_s27 + $0x38] sm:$0xff] }
  0x94   : > { %1680 = vmatmul.mubr.msk.f32.vlgmr.msra.gmra.mrb[0].mxu1 %vm412_vm1, %v341_v21  ;;  %1750 = vmatpush3.bf16.msra.mxu0 %v1749_v20  ;;  %v361_v12 = vld [vmem:[%s2248_s27 + $0x68] sm:$0xff]  ;;  %v360_v25 = vld [vmem:[%s2248_s27 + $0x60] sm:$0xff] }
  0x95   : > { %1756 = vmatpush3.bf16.msra.mxu1 %v1755_v22  ;;  %1751 = vmatprep.subr.bf16.mxu0 %v1993_v0  ;;  %v363_v22 = vld [vmem:[%s2248_s27 + $0x78] sm:$0xff] }
  0x96   : > { %1757 = vmatprep.subr.bf16.mxu1 %v1993_v0  ;;  %1690 = vmatprep.mubr.msk.f32.mxu0 %vm1994_vm0, %v1995_v1 }
  0x97   : > { %1701 = vmatprep.mubr.msk.f32.mxu1 %vm1994_vm0, %v1995_v1 }
  0x98   : > { %1753 = vmatpush3.bf16.msra.mxu0 %v1752_v27 }
  0x99   : > { %1759 = vmatpush3.bf16.msra.mxu1 %v1758_v28  ;;  %785 = vxpose.xlu0.b32.start.end [1/1] (short) (narrow) %v341_v21, 32 }
  0x9b   : > { %1691 = vmatmul.mubr.msk.f32.vlgmr.msra.gmra.mrb[2].mxu0 %vm412_vm1, %v342_v19  ;;  %849 = vxpose.xlu1.b32.start.end [1/1] (short) (narrow) %v343_v29, 32 }
  0x9c   : > { %1702 = vmatmul.mubr.msk.f32.vlgmr.msra.gmra.mrb[2].mxu1 %vm412_vm1, %v343_v29 }
 0x10c   : > { %v769_v30 = vpop.trf.xlu0 }
 0x10d   : > { %1706 = vmatprep.mubr.msk.f32.mxu0 %vm881_vm2, %v769_v30 }
 0x10e   : > { %v833_v35 = vpop.trf.xlu1 }
 0x110   : > { %v770_v31 = vpop.trf.xlu0 }
 0x112   : > { %v834_v36 = vpop.trf.xlu1 }
 0x114   : > { %v771_v32 = vpop.trf.xlu0 }
 0x116   : > { %v835_v37 = vpop.trf.xlu1 }
 0x118   : > { %v772_v33 = vpop.trf.xlu0 }
 0x11a   : > { %v836_v38 = vpop.trf.xlu1 }
 0x11c   : > { %v801_v34 = vpop.trf.xlu0 }
 0x11d   : > { %1714 = vmatprep.mubr.msk.f32.mxu1 %vm881_vm2, %v801_v34 }
 0x11e   : > { %v865_v44 = vpop.trf.xlu1 }
 0x120   : > { %v802_v41 = vpop.trf.xlu0 }
 0x122   : > { %v866_v58 = vpop.trf.xlu1 }
 0x124   : > { %v803_v54 = vpop.trf.xlu0 }
 0x126   : > { %v867_v7 = vpop.trf.xlu1 }
 0x128   : > { %v804_v4 = vpop.trf.xlu0 }
 0x12a   : > { %v868_v9 = vpop.trf.xlu1 }
 0x166   : > { %v482_v43 = vpop.f32.mrb[0].mxu0 }
 0x167   : > { %v483_v45 = vadd.f32 %v1588_v39, %v482_v43  ;;  %v555_v47 = vpop.f32.mrb[0].mxu1  ;;  %v1670_v48 = vpop.f32.mrb[1].mxu0 }
 0x168   : > { %v556_v49 = vadd.f32 %v1589_v40, %v555_v47  ;;  %v1681_v50 = vpop.f32.mrb[1].mxu1  ;;  %v369_v47 = vld [vmem:[%s2248_s27 + $0xa8] sm:$0xff] }
 0x169   : > { %v2290_v51 = vsub.f32 %v483_v45, %v344_v42  ;;  %v377_v42 = vld [vmem:[%s2248_s27 + $0xe8] sm:$0xff] }
 0x16a   : > { %v2292_v52 = vsub.f32 %v556_v49, %v345_v46 }
 0x16b   : > { %v2295_v53 = vmul.f32 0.001953125, %v2290_v51 }
 0x16c   : > { %v2298_v55 = vmul.f32 0.001953125, %v2292_v52 }
 0x16d   : > { %1704 = vmatprep.subr.mxu0 %v2295_v53  ;;  %v1270_v40 = vrot.slane %v2295_v53, 4 }
 0x16e   : > { %v628_v60 = vpop.f32.mrb[2].mxu0  ;;  %1705 = vmatpush3.msra.mxu0 %v2295_v53  ;;  %1712 = vmatprep.subr.mxu1 %v2298_v55 }
 0x16f   : > { %v629_v61 = vadd.f32 %v1590_v56, %v628_v60  ;;  %v701_v63 = vpop.f32.mrb[2].mxu1  ;;  %1707 = vmatmul.mubr.msk.f32.vlgmr.msra.gmra.mrb[4].mxu0 %vm881_vm2, %v770_v31  ;;  %1713 = vmatpush3.msra.mxu1 %v2298_v55  ;;  %v1692_v0 = vpop.f32.mrb[3].mxu0  ;;  %v362_v31 = vld [vmem:[%s2248_s27 + $0x70] sm:$0xff]  ;;  %v1271_v56 = vadd.f32 %v1270_v40, %v2295_v53 }
 0x170   : > { %v702_v1 = vadd.f32 %v1591_v57, %v701_v63  ;;  %1709 = vmatprep.mubr.msk.f32.mxu0 %vm881_vm2, %v771_v32  ;;  %v1703_v2 = vpop.f32.mrb[3].mxu1  ;;  %1715 = vmatmul.mubr.msk.f32.vlgmr.msra.gmra.mrb[4].mxu1 %vm881_vm2, %v802_v41  ;;  %v376_v0 = vld [vmem:[%s2248_s27 + $0xe0] sm:$0xff] }
 0x171   : > { %v2311_v3 = vsub.f32 %v629_v61, %v346_v59  ;;  %1717 = vmatprep.mubr.msk.f32.mxu1 %vm881_vm2, %v803_v54  ;;  %v368_v61 = vld [vmem:[%s2248_s27 + $0xa0] sm:$0xff] }
 0x172   : > { %v2314_v5 = vsub.f32 %v702_v1, %v347_v62  ;;  %v1276_v62 = vrot.slane %v2298_v55, 4  ;;  %v1272_v1 = vrot.slane %v1271_v56, 2 }
 0x173   : > { %v2317_v6 = vmul.f32 0.001953125, %v2311_v3  ;;  %1710 = vmatmul.mubr.msk.f32.gmra.mrb[6].mxu0 %vm881_vm2, %v772_v33 }
 0x174   : > { %v2321_v8 = vmul.f32 0.001953125, %v2314_v5  ;;  %1722 = vmatprep.mubr.msk.f32.mxu0 %vm881_vm2, %v833_v35  ;;  %1718 = vmatmul.mubr.msk.f32.gmra.mrb[6].mxu1 %vm881_vm2, %v804_v4  ;;  %v379_v4 = vld [vmem:[%s2248_s27 + $0xf8] sm:$0xff] }
 0x175   : > { %1720 = vmatprep.subr.mxu0 %v2317_v6  ;;  %1730 = vmatprep.mubr.msk.f32.mxu1 %vm881_vm2, %v865_v44  ;;  %v1282_v57 = vrot.slane %v2317_v6, 4 }
 0x176   : > { %1721 = vmatpush3.msra.mxu0 %v2317_v6  ;;  %1728 = vmatprep.subr.mxu1 %v2321_v8 }
 0x177   : > { %1723 = vmatmul.mubr.msk.f32.vlgmr.msra.gmra.mrb[8].mxu0 %vm881_vm2, %v834_v36  ;;  %1729 = vmatpush3.msra.mxu1 %v2321_v8  ;;  %v354_v36 = vld [vmem:[%s2248_s27 + $0x30] sm:$0xff]  ;;  %v1283_v2 = vadd.f32 %v1282_v57, %v2317_v6 }
 0x178   : > { %1725 = vmatprep.mubr.msk.f32.mxu0 %vm881_vm2, %v835_v37  ;;  %1731 = vmatmul.mubr.msk.f32.vlgmr.msra.gmra.mrb[8].mxu1 %vm881_vm2, %v866_v58  ;;  %v370_v6 = vld [vmem:[%s2248_s27 + $0xb0] sm:$0xff] }
 0x179   : > { %1733 = vmatprep.mubr.msk.f32.mxu1 %vm881_vm2, %v867_v7 }
 0x17b   : > { %1726 = vmatmul.mubr.msk.f32.gmra.mrb[10].mxu0 %vm881_vm2, %v836_v38 }
 0x17c   : > { %1734 = vmatmul.mubr.msk.f32.gmra.mrb[10].mxu1 %vm881_vm2, %v868_v9 }
 0x242   : > { %v1708_v13 = vpop.f32.mrb[4].mxu0 }
 0x243   : > { %v1295_v14 = vsub.f32 %v1708_v13, %v353_v10  ;;  %v960_v15 = vpop.f32.mrb[5].mxu0  ;;  %v1716_v16 = vpop.f32.mrb[4].mxu1  ;;  %v1277_v10 = vadd.f32 %v1276_v62, %v2298_v55 }
 0x244   : > { %v1294_v17 = vsub.f32 %v960_v15, %v352_v11  ;;  %v1299_v19 = vsub.f32 %v1716_v16, %v361_v12  ;;  %v1057_v20 = vpop.f32.mrb[5].mxu1  ;;  %v1288_v11 = vrot.slane %v2321_v8, 4  ;;  %v371_v12 = vld [vmem:[%s2248_s27 + $0xb8] sm:$0xff]  ;;  %v1284_v15 = vrot.slane %v1283_v2, 2 }
 0x245   : > { %v1315_v21 = vmul.f32 %v1295_v14, %v1295_v14  ;;  %v1298_v34 = vsub.f32 %v1057_v20, %v360_v25  ;;  %v1273_v14 = vadd.f32 %v1272_v1, %v1271_v56  ;;  %v378_v25 = vld [vmem:[%s2248_s27 + $0xf0] sm:$0xff] }
 0x246   : > { %v1314_v23 = vmul.f32 %v1294_v17, %v1294_v17  ;;  %v1711_v24 = vpop.f32.mrb[6].mxu0  ;;  %v1319_v27 = vmul.f32 %v1299_v19, %v1299_v19  ;;  %v1278_v19 = vrot.slane %v1277_v10, 2  ;;  %v1289_v20 = vadd.f32 %v1288_v11, %v2321_v8 }
 0x247   : > { %v1297_v26 = vsub.f32 %v1711_v24, %v355_v18  ;;  %1332 = vadd.xlane.f32.xlu1 %v1315_v21  ;;  %v970_v28 = vpop.f32.mrb[7].mxu0  ;;  %v1719_v29 = vpop.f32.mrb[6].mxu1  ;;  %v1318_v44 = vmul.f32 %v1298_v34, %v1298_v34  ;;  %v1274_v55 = vrot.slane %v1273_v14, 1  ;;  %v709_v8 = vmul.f32 %v2290_v51, %v2290_v51 }
 0x248   : > { %1330 = vadd.xlane.f32.xlu0 %v1314_v23  ;;  %v1301_v30 = vsub.f32 %v1719_v29, %v363_v22  ;;  %v1067_v32 = vpop.f32.mrb[7].mxu1  ;;  %v1296_v45 = vsub.f32 %v970_v28, %v354_v36  ;;  %v1285_v22 = vadd.f32 %v1284_v15, %v1283_v2  ;;  %v710_v51 = vmul.f32 %v2292_v52, %v2292_v52 }
 0x249   : > { %v1317_v33 = vmul.f32 %v1297_v26, %v1297_v26  ;;  %v1300_v38 = vsub.f32 %v1067_v32, %v362_v31  ;;  %v1279_v26 = vadd.f32 %v1278_v19, %v1277_v10  ;;  %v1275_v28 = vadd.f32 %v1274_v55, %v1273_v14 }
 0x24a   : > { %v1724_v35 = vpop.f32.mrb[8].mxu0  ;;  %v1321_v41 = vmul.f32 %v1301_v30, %v1301_v30  ;;  %v1316_v59 = vmul.f32 %v1296_v45, %v1296_v45  ;;  %v1286_v29 = vrot.slane %v1285_v22, 1  ;;  %v381_v30 = vld [vmem:[%s2250_s7 + $0x1] sm:$0x1] }
 0x24b   : > { %1340 = vadd.xlane.f32.xlu1 %v1319_v27  ;;  %v1154_v37 = vpop.f32.mrb[9].mxu0  ;;  %v1732_v39 = vpop.f32.mrb[8].mxu1  ;;  %v1320_v48 = vmul.f32 %v1300_v38, %v1300_v38  ;;  %v1303_v60 = vsub.f32 %v1724_v35, %v369_v47  ;;  %v1290_v27 = vrot.slane %v1289_v20, 2  ;;  %v1310_v35 = vsub.f32 %v1275_v28, %v381_v30 }
 0x24c   : > { %1336 = vadd.xlane.f32.xlu0 %v1317_v33  ;;  %v1251_v43 = vpop.f32.mrb[9].mxu1  ;;  %v1307_v50 = vsub.f32 %v1732_v39, %v377_v42  ;;  %v1302_v53 = vsub.f32 %v1154_v37, %v368_v61  ;;  %v1280_v33 = vrot.slane %v1279_v26, 1  ;;  %v1287_v36 = vadd.f32 %v1286_v29, %v1285_v22  ;;  %v385_v37 = vld [vmem:[%s2250_s7 + $0x5] sm:$0x1] }
 0x24d   : > { %v1323_v7 = vmul.f32 %v1303_v60, %v1303_v60  ;;  %v1306_v9 = vsub.f32 %v1251_v43, %v376_v0  ;;  %v1291_v34 = vadd.f32 %v1290_v27, %v1289_v20  ;;  %v711_v39 = vmul.f32 %v2311_v3, %v2311_v3 }
 0x24e   : > { %v1727_v46 = vpop.f32.mrb[10].mxu0  ;;  %v1327_v63 = vmul.f32 %v1307_v50, %v1307_v50  ;;  %v1322_v16 = vmul.f32 %v1302_v53, %v1302_v53  ;;  %v1281_v40 = vadd.f32 %v1280_v33, %v1279_v26  ;;  %v1398_v42 = vmul.f32 %v1310_v35, %v1310_v35 }
 0x24f   : > { %1338 = vadd.xlane.f32.xlu1 %v1318_v44  ;;  %v1164_v49 = vpop.f32.mrb[11].mxu0  ;;  %v1735_v54 = vpop.f32.mrb[10].mxu1  ;;  %v1305_v17 = vsub.f32 %v1727_v46, %v371_v12  ;;  %v1326_v18 = vmul.f32 %v1306_v9, %v1306_v9  ;;  %v1312_v43 = vsub.f32 %v1287_v36, %v385_v37  ;;  %v383_v44 = vld [vmem:[%s2250_s7 + $0x3] sm:$0x1]  ;;  %v712_v3 = vmul.f32 %v2314_v5, %v2314_v5 }
 0x250   : > { %1344 = vadd.xlane.f32.xlu0 %v1321_v41  ;;  %v1261_v58 = vpop.f32.mrb[11].mxu1  ;;  %v1309_v13 = vsub.f32 %v1735_v54, %v379_v4  ;;  %v1304_v23 = vsub.f32 %v1164_v49, %v370_v6  ;;  %v1292_v41 = vrot.slane %v1291_v34, 1  ;;  %v1311_v45 = vsub.f32 %v1281_v40, %v383_v44  ;;  %v387_v49 = vld [vmem:[%s2250_s7 + $0x7] sm:$0x1] }
 0x251   : > { %v1325_v24 = vmul.f32 %v1305_v17, %v1305_v17  ;;  %v1308_v32 = vsub.f32 %v1261_v58, %v378_v25  ;;  %v1403_v47 = vsel %vm1402_vm3, %v1398_v42, 0.0 }
 0x252   : > { %v1329_v21 = vmul.f32 %v1309_v13, %v1309_v13  ;;  %v1324_v31 = vmul.f32 %v1304_v23, %v1304_v23  ;;  %v1293_v46 = vadd.f32 %v1292_v41, %v1291_v34  ;;  %v1399_v50 = vmul.f32 %v1311_v45, %v1311_v45 }
 0x253   : > { %1342 = vadd.xlane.f32.xlu1 %v1320_v48  ;;  %v1328_v38 = vmul.f32 %v1308_v32, %v1308_v32  ;;  %v1400_v48 = vmul.f32 %v1312_v43, %v1312_v43 }
 0x254   : > { %1334 = vadd.xlane.f32.xlu0 %v1316_v59  ;;  %v1313_v54 = vsub.f32 %v1293_v46, %v387_v49  ;;  %v1406_v57 = vsel %vm1402_vm3, %v1399_v50, 0.0 }
 0x255   : > { %v1409_v56 = vsel %vm1402_vm3, %v1400_v48, 0.0 }
 0x256   : > { %v1401_v52 = vmul.f32 %v1313_v54, %v1313_v54 }
 0x257   : > { %1356 = vadd.xlane.f32.xlu1 %v1327_v63 }
 0x258   : > { %1348 = vadd.xlane.f32.xlu0 %v1323_v7  ;;  %v1412_v58 = vsel %vm1402_vm3, %v1401_v52, 0.0 }
 0x25b   : > { %1346 = vadd.xlane.f32.xlu1 %v1322_v16 }
 0x25c   : > { %1354 = vadd.xlane.f32.xlu0 %v1326_v18 }
 0x25f   : > { %1360 = vadd.xlane.f32.xlu1 %v1329_v21 }
 0x260   : > { %1352 = vadd.xlane.f32.xlu0 %v1325_v24 }
 0x263   : > { %1350 = vadd.xlane.f32.xlu1 %v1324_v31 }
 0x264   : > { %713 = vadd.xlane.f32.xlu0 %v709_v8 }
 0x267   : > { %1358 = vadd.xlane.f32.xlu1 %v1328_v38 }
 0x268   : > { %717 = vadd.xlane.f32.xlu0 %v711_v39 }
 0x26b   : > { %715 = vadd.xlane.f32.xlu1 %v710_v51 }
 0x26c   : > { %1404 = vadd.xlane.f32.xlu0 %v1403_v47 }
 0x26f   : > { %719 = vadd.xlane.f32.xlu1 %v712_v3 }
 0x270   : > { %1410 = vadd.xlane.f32.xlu0 %v1409_v56 }
 0x273   : > { %1407 = vadd.xlane.f32.xlu1 %v1406_v57 }
 0x277   : > { %1413 = vadd.xlane.f32.xlu1 %v1412_v58 }
 0x2d4   : > { %v1333_v59 = vpop.xlane.xlu1 %1332 }
 0x2d5   : > { %v1331_v60 = vpop.xlane.xlu0 %1330 }
 0x2d6   : > { %v1362_v5 = vadd.f32 %v1333_v59, %v1331_v60 }
 0x2d8   : > { %v1341_v61 = vpop.xlane.xlu1 %1340 }
 0x2d9   : > { %v1337_v62 = vpop.xlane.xlu0 %1336 }
 0x2dc   : > { %v1339_v63 = vpop.xlane.xlu1 %1338 }
 0x2dd   : > { %v1345_v0 = vpop.xlane.xlu0 %1344  ;;  %v1371_v1 = vadd.f32 %v1341_v61, %v1339_v63 }
 0x2e0   : > { %v1343_v2 = vpop.xlane.xlu1 %1342 }
 0x2e1   : > { %v1335_v4 = vpop.xlane.xlu0 %1334  ;;  %v1372_v53 = vadd.f32 %v1371_v1, %v1343_v2 }
 0x2e2   : > { %v1363_v7 = vadd.f32 %v1362_v5, %v1335_v4 }
 0x2e3   : > { %v1373_v12 = vadd.f32 %v1372_v53, %v1345_v0 }
 0x2e4   : > { %v1364_v9 = vadd.f32 %v1363_v7, %v1337_v62  ;;  %v1357_v10 = vpop.xlane.xlu1 %1356 }
 0x2e5   : > { %v1349_v11 = vpop.xlane.xlu0 %1348  ;;  %v1374_v17 = vrot.slane %v1373_v12, 4 }
 0x2e6   : > { %v1365_v13 = vrot.slane %v1364_v9, 4 }
 0x2e7   : > { %v1375_v20 = vadd.f32 %v1374_v17, %v1373_v12 }
 0x2e8   : > { %v1366_v14 = vadd.f32 %v1365_v13, %v1364_v9  ;;  %v1347_v15 = vpop.xlane.xlu1 %1346 }
 0x2e9   : > { %v1355_v16 = vpop.xlane.xlu0 %1354  ;;  %v1380_v21 = vadd.f32 %v1349_v11, %v1347_v15  ;;  %v1376_v26 = vrot.slane %v1375_v20, 2 }
 0x2ea   : > { %v1367_v18 = vrot.slane %v1366_v14, 2  ;;  %v1389_v27 = vadd.f32 %v1357_v10, %v1355_v16 }
 0x2eb   : > { %v1377_v35 = vadd.f32 %v1376_v26, %v1375_v20 }
 0x2ec   : > { %v1361_v6 = vpop.xlane.xlu1 %1360  ;;  %v1368_v22 = vadd.f32 %v1367_v18, %v1366_v14 }
 0x2ed   : > { %v1353_v19 = vpop.xlane.xlu0 %1352  ;;  %v1378_v47 = vrot.slane %v1377_v35, 1 }
 0x2ee   : > { %v1369_v31 = vrot.slane %v1368_v22, 1 }
 0x2ef   : > { %v1379_v61 = vadd.f32 %v1378_v47, %v1377_v35 }
 0x2f0   : > { %v1351_v55 = vpop.xlane.xlu1 %1350  ;;  %v1370_v41 = vadd.f32 %v1369_v31, %v1368_v22 }
 0x2f1   : > { %v1381_v23 = vadd.f32 %v1380_v21, %v1351_v55  ;;  %v714_v24 = vpop.xlane.xlu0 %713 }
 0x2f2   : > { %v721_v25 = vrot.slane %v714_v24, 4 }
 0x2f3   : > { %v1382_v28 = vadd.f32 %v1381_v23, %v1353_v19 }
 0x2f4   : > { %v722_v29 = vadd.f32 %v721_v25, %v714_v24  ;;  %v1359_v30 = vpop.xlane.xlu1 %1358 }
 0x2f5   : > { %v1383_v32 = vrot.slane %v1382_v28, 4  ;;  %v1390_v8 = vadd.f32 %v1389_v27, %v1359_v30  ;;  %v718_v33 = vpop.xlane.xlu0 %717 }
 0x2f6   : > { %v733_v34 = vrot.slane %v718_v33, 4  ;;  %v723_v38 = vrot.slane %v722_v29, 2 }
 0x2f7   : > { %v1384_v36 = vadd.f32 %v1383_v32, %v1382_v28  ;;  %v1391_v37 = vadd.f32 %v1390_v8, %v1361_v6 }
 0x2f8   : > { %v734_v39 = vadd.f32 %v733_v34, %v718_v33  ;;  %v716_v40 = vpop.xlane.xlu1 %715  ;;  %v724_v50 = vadd.f32 %v723_v38, %v722_v29 }
 0x2f9   : > { %v1392_v42 = vrot.slane %v1391_v37, 4  ;;  %v727_v43 = vrot.slane %v716_v40, 4  ;;  %v1405_v44 = vpop.xlane.xlu0 %1404  ;;  %v1385_v51 = vrot.slane %v1384_v36, 2 }
 0x2fa   : > { %v735_v45 = vrot.slane %v734_v39, 2  ;;  %v1419_v46 = vadd.f32 %v1405_v44, %v1370_v41  ;;  %v725_v4 = vrot.slane %v724_v50, 1 }
 0x2fb   : > { %v1393_v48 = vadd.f32 %v1392_v42, %v1391_v37  ;;  %v728_v49 = vadd.f32 %v727_v43, %v716_v40  ;;  %v1386_v3 = vadd.f32 %v1385_v51, %v1384_v36 }
 0x2fc   : > { %v1423_v54 = vmul.f32 0.5, %v1419_v46  ;;  %v720_v56 = vpop.xlane.xlu1 %719  ;;  %v736_v60 = vadd.f32 %v735_v45, %v734_v39  ;;  %v726_v6 = vadd.f32 %v725_v4, %v724_v50 }
 0x2fd   : > { %v729_v57 = vrot.slane %v728_v49, 2  ;;  %v739_v52 = vrot.slane %v720_v56, 4  ;;  %v1387_v58 = vrot.slane %v1386_v3, 1  ;;  %v1394_v59 = vrot.slane %v1393_v48, 2  ;;  %v1411_v1 = vpop.xlane.xlu0 %1410 }
 0x2fe   : > { %1428 = vst.msk [vmem:[%s2380_s13] sm:$0x1] %vm1427_vm4, %v1423_v54  ;;  %v737_v12 = vrot.slane %v736_v60, 1  ;;  %v745_v23 = vmul.f32 0.0009765625, %v726_v6 }
 0x2ff   : > { %v730_v62 = vadd.f32 %v729_v57, %v728_v49  ;;  %v740_v63 = vadd.f32 %v739_v52, %v720_v56  ;;  %v1388_v0 = vadd.f32 %v1387_v58, %v1386_v3  ;;  %v1395_v5 = vadd.f32 %v1394_v59, %v1393_v48 }
 0x300   : > { %v1408_v2 = vpop.xlane.xlu1 %1407  ;;  %v738_v21 = vadd.f32 %v737_v12, %v736_v60  ;;  %1433 = vst.msk [vmem:[%s2380_s13] sm:$0x1] %vm1432_vm5, %v745_v23 }
 0x301   : > { %v741_v53 = vrot.slane %v740_v63, 2  ;;  %v1421_v7 = vadd.f32 %v1411_v1, %v1388_v0  ;;  %v1420_v9 = vadd.f32 %v1408_v2, %v1379_v61  ;;  %v731_v10 = vrot.slane %v730_v62, 1 }
 0x302   : > { %v1396_v11 = vrot.slane %v1395_v5, 1  ;;  %v747_v25 = vmul.f32 0.0009765625, %v738_v21 }
 0x303   : > { %v742_v13 = vadd.f32 %v741_v53, %v740_v63  ;;  %v1425_v14 = vmul.f32 0.5, %v1421_v7  ;;  %v1424_v15 = vmul.f32 0.5, %v1420_v9  ;;  %v732_v19 = vadd.f32 %v731_v10, %v730_v62 }
 0x304   : > { %v1397_v16 = vadd.f32 %v1396_v11, %v1395_v5  ;;  %v1414_v17 = vpop.xlane.xlu1 %1413 }
 0x305   : > { %v743_v18 = vrot.slane %v742_v13, 1  ;;  %1429 = vst.msk [vmem:[%s2380_s13 + $0x1] sm:$0x1] %vm1427_vm4, %v1424_v15  ;;  %1430 = vst.msk [vmem:[%s2380_s13 + $0x2] sm:$0x1] %vm1427_vm4, %v1425_v14  ;;  %v746_v24 = vmul.f32 0.0009765625, %v732_v19 }
 0x306   : > { %v1422_v20 = vadd.f32 %v1414_v17, %v1397_v16  ;;  %1435 = vst.msk [vmem:[%s2380_s13 + $0x2] sm:$0x1] %vm1432_vm5, %v747_v25 }
 0x307   : > { %v744_v55 = vadd.f32 %v743_v18, %v742_v13  ;;  %1434 = vst.msk [vmem:[%s2380_s13 + $0x1] sm:$0x1] %vm1432_vm5, %v746_v24 }
 0x308   : > { %v1426_v22 = vmul.f32 0.5, %v1422_v20 }
 0x309   : > { %v748_v26 = vmul.f32 0.0009765625, %v744_v55 }
 0x30a   : > { %1431 = vst.msk [vmem:[%s2380_s13 + $0x3] sm:$0x1] %vm1427_vm4, %v1426_v22 }
 0x30b   : > { %1436 = vst.msk [vmem:[%s2380_s13 + $0x3] sm:$0x1] %vm1432_vm5, %v748_v26 }
 0x30c PF: > { %p20_p3 = scmp.ge.s32.totalorder %s2043_s20, 4   ;;  %s2421_s15 = smov %s1975_s16 }
 0x30d   : > { %s2422_s16 = smov %s1979_s17  ;;  %s2423_s17 = smov %s2053_s23 }
 0x30e   : > { %s2424_s18 = smov %s2043_s20  ;;  %22 = sbr.rel (!%p20_p3) target bundleno = 7 (0x7), region = 113 }
 0x315   :  { %1457 = vsyncpa [#allocation3], 1 }
 0x316   :  { %1459 = vsyncpa [#allocation3 + $0x1], 1 }
 0x317   :  { %1460 = vsyncpa [#allocation5], 1 }
 0x318   :  { %1462 = vsyncpa [#allocation5 + $0x1], 1 }
 0x319   :  { %1463 = vsyncpa [#allocation8], 1 }
 0x31a   :  { %1465 = vsyncpa [#allocation8 + $0x1], 1 }

</bundles_post_ra>
